<compile_context>
chip_gen: v5e
topology: v5e:2x2
jax: 0.10.0
libtpu: 0.0.40
codegen_flags: <defaults>
</compile_context>

<pallas_src>
import functools

import jax
import jax.numpy as jnp
from jax import lax
from jax.experimental import pallas as pl
from jax.experimental.pallas import tpu as pltpu


def _round_up(a, m):
    return ((a + m - 1) // m) * m


@functools.lru_cache(maxsize=None)
def _vmem_capacity_bytes():
    """Best-effort per-core VMEM capacity; conservative (v7x) fallback."""
    try:
        info = pltpu.get_tpu_info()
        for attr in ("vmem_capacity_bytes", "vmem_size_bytes", "vmem_bytes"):
            v = getattr(info, attr, None)
            if v:
                return int(v)
    except Exception:
        pass
    try:
        kind = jax.devices()[0].device_kind.lower()
        if ("v4" in kind) or ("v5" in kind) or ("v6" in kind):
            return 128 * 1024 * 1024
    except Exception:
        pass
    return 64 * 1024 * 1024  # conservative: v7x per-TensorCore VMEM


def _choose_tiles(N, V, itemsize, budget_bytes):
    """Pick (tile_n, v_chunk) so the real per-step footprint fits `budget_bytes`.

    Footprint model: 2 * tn*vc*itemsize (double-buffered input block) plus ~4
    chunk-sized 32-bit temporaries materialized by the kernel body.
    """
    mult = 8 if itemsize >= 4 else (16 if itemsize == 2 else 32)
    K_TEMPS = 4
    per_elem = 2 * itemsize + 4 * K_TEMPS
    elem_budget = max(budget_bytes // per_elem, mult * 128)

    # Keep >= 2 row blocks so the "parallel" row axis can split across both
    # TensorCores on v7x (harmless on single-TC v5e/v6e).
    half_rows = max(mult, _round_up((N + 1) // 2, mult))
    tn_cap = min(2048, _round_up(N, mult), half_rows)

    if V * mult <= elem_budget:
        # Whole vocab fits as a single lane chunk with at least `mult` rows.
        v_chunk = V
        tile_n = (elem_budget // V) // mult * mult
    else:
        # Stream the vocab in lane-aligned chunks with a minimal row tile.
        v_chunk = max(128, ((elem_budget // mult) // 128) * 128)
        tile_n = mult
    tile_n = max(mult, min(tile_n, tn_cap))
    return int(tile_n), int(v_chunk)


def _ce_kernel(logits_ref, tgt_ref, loss_ref, corr_ref,
               m_sc, s_sc, tgt_sc, idx_sc,
               *, n_classes, v_chunk, ignore_index):
    """Grid step (i, k): vocab chunk k of row tile i, online LSE across k."""
    k = pl.program_id(1)
    n_k = pl.num_programs(1)

    @pl.when(k == 0)
    def _init():
        m_sc[...] = jnp.full_like(m_sc, -jnp.inf)
        s_sc[...] = jnp.zeros_like(s_sc)
        tgt_sc[...] = jnp.full_like(tgt_sc, -jnp.inf)
        idx_sc[...] = jnp.full_like(idx_sc, n_classes)      # sentinel > any class idx

    t = tgt_ref[...]                                         # (tn, 1) int32
    xf = logits_ref[...].astype(jnp.float32)                 # (tn, vc) f32 (needed for exp)
    tn, vc = xf.shape

    col = k * v_chunk + lax.broadcasted_iota(jnp.int32, (tn, vc), 1)   # global class idx
    neg_inf = jnp.float32(-jnp.inf)

    if n_classes % v_chunk != 0:
        # Ragged last chunk: padded lanes must not contribute to max / sum / argmax.
        xf = jnp.where(col < n_classes, xf, neg_inf)

    # --- online (streaming) log-sum-exp across vocab chunks ---
    cmax = jnp.max(xf, axis=-1, keepdims=True)               # (tn, 1)
    m_old = m_sc[...]
    m_new = jnp.maximum(m_old, cmax)
    p = jnp.exp(xf - m_new)                                  # (tn, vc); exp -> EUP
    s_sc[...] = s_sc[...] * jnp.exp(m_old - m_new) + jnp.sum(p, axis=-1, keepdims=True)
    m_sc[...] = m_new

    # --- gather logit of the target class (fused select + lane max-reduce) ---
    tgt_chunk = jnp.max(jnp.where(col == t, xf, neg_inf), axis=-1, keepdims=True)
    tgt_sc[...] = jnp.maximum(tgt_sc[...], tgt_chunk)

    # --- running first-argmax (exact torch tie-break: lowest class index wins) ---
    idx_chunk = jnp.min(jnp.where(xf == cmax, col, n_classes), axis=-1, keepdims=True)
    # strictly-greater => earlier chunks keep ties, preserving first-index semantics
    idx_sc[...] = jnp.where(cmax > m_old, idx_chunk, idx_sc[...])

    @pl.when(k == n_k - 1)
    def _finalize():
        nll = (jnp.log(s_sc[...]) + m_sc[...]) - tgt_sc[...]           # (tn, 1)
        ignored = t == ignore_index
        loss_ref[...] = jnp.where(ignored, 0.0, nll)                   # ignored rows -> 0
        corr_ref[...] = (idx_sc[...] == t).astype(jnp.int32)


@functools.partial(jax.jit, static_argnames=("tile_n", "v_chunk", "ignore_index"))
def cross_entropy_pallas(logits, targets, tile_n=None, v_chunk=None, ignore_index=-100):
    """logits: (..., V) float (f32 or bf16); targets: (...,) int with same leading dims.

    Returns (loss, correct) matching CrossEntropy.forward:
      loss    = F.nll_loss(log_softmax(logits, -1).view(-1, V), targets.view(-1),
                           reduction='mean')          # ignore_index=-100 honored
      correct = sum(argmax(lprobs, -1) == targets)
    """
    V = logits.shape[-1]
    x2d = logits.reshape(-1, V)                      # keep native dtype (bf16 stays bf16)
    N = x2d.shape[0]
    t2d = targets.reshape(-1, 1).astype(jnp.int32)

    # Generation-aware scoped-VMEM limit and per-step footprint budget.
    cap = _vmem_capacity_bytes()
    if cap >= 96 * 1024 * 1024:                      # v5e / v6e (128 MiB physical VMEM)
        vmem_limit = 64 * 1024 * 1024
    else:                                            # v7x (64 MiB) or unknown
        vmem_limit = 40 * 1024 * 1024
    budget = (vmem_limit * 7) // 16                  # ~44% of the scoped limit

    auto_tn, auto_vc = _choose_tiles(N, V, x2d.dtype.itemsize, budget)
    if tile_n is None:
        tile_n = auto_tn
    if v_chunk is None:
        v_chunk = auto_vc

    grid = (pl.cdiv(N, tile_n), pl.cdiv(V, v_chunk))

    kernel = functools.partial(_ce_kernel, n_classes=V, v_chunk=v_chunk,
                               ignore_index=ignore_index)

    loss_rows, corr_rows = pl.pallas_call(
        kernel,
        out_shape=(
            jax.ShapeDtypeStruct((N, 1), jnp.float32),
            jax.ShapeDtypeStruct((N, 1), jnp.int32),
        ),
        grid_spec=pltpu.PrefetchScalarGridSpec(
            num_scalar_prefetch=0,
            grid=grid,
            in_specs=[
                pl.BlockSpec((tile_n, v_chunk), lambda i, k: (i, k)),
                pl.BlockSpec((tile_n, 1), lambda i, k: (i, 0)),
            ],
            out_specs=(
                pl.BlockSpec((tile_n, 1), lambda i, k: (i, 0)),
                pl.BlockSpec((tile_n, 1), lambda i, k: (i, 0)),
            ),
            scratch_shapes=[
                pltpu.VMEM((tile_n, 1), jnp.float32),   # running max  m
                pltpu.VMEM((tile_n, 1), jnp.float32),   # running sum  s
                pltpu.VMEM((tile_n, 1), jnp.float32),   # target logit
                pltpu.VMEM((tile_n, 1), jnp.int32),     # running first-argmax idx
            ],
        ),
        compiler_params=pltpu.CompilerParams(
            dimension_semantics=("parallel", "arbitrary"),   # rows megacore-split; vocab sequential
            vmem_limit_bytes=vmem_limit,
        ),
    )(x2d, t2d)

    # Tiny epilogue in XLA: mean over non-ignored rows (PyTorch nll_loss semantics).
    n_valid = jnp.sum((t2d != ignore_index).astype(jnp.int32))
    loss = jnp.sum(loss_rows) / jnp.maximum(n_valid, 1).astype(jnp.float32)
    correct = jnp.sum(corr_rows)
    return loss, correct


def _reference(logits, targets, ignore_index=-100):
    V = logits.shape[-1]
    x = logits.reshape(-1, V).astype(jnp.float32)
    t = targets.reshape(-1)
    lprobs = jax.nn.log_softmax(x, axis=-1)
    valid = t != ignore_index
    t_safe = jnp.where(valid, t, 0)
    nll = -lprobs[jnp.arange(x.shape[0]), t_safe]
    loss = jnp.sum(jnp.where(valid, nll, 0.0)) / jnp.maximum(jnp.sum(valid), 1)
    correct = jnp.sum(jnp.argmax(lprobs, axis=1) == t)
    return loss, correct


if __name__ == "__main__":
    key = jax.random.PRNGKey(0)
    k1, k2, k3, k4, k5, k6 = jax.random.split(key, 6)

    # Case 1: small "model output" logits (B, T, V), f32, divisible row count.
    B, T, V = 2, 8, 32
    logits = jax.random.normal(k1, (B, T, V), dtype=jnp.float32)
    targets = jax.random.randint(k2, (B, T), 0, V, dtype=jnp.int32)
    loss, correct = cross_entropy_pallas(logits, targets)
    jax.block_until_ready((loss, correct))
    ref_loss, ref_correct = _reference(logits, targets)
    assert jnp.allclose(loss, ref_loss, atol=1e-5, rtol=1e-5), (loss, ref_loss)
    assert int(correct) == int(ref_correct), (correct, ref_correct)

    # Case 2: non-divisible row count (N=15) + bf16 logits (native-dtype HBM path).
    B2, T2, V2 = 3, 5, 40
    logits2 = jax.random.normal(k3, (B2, T2, V2), dtype=jnp.float32).astype(jnp.bfloat16)
    targets2 = jax.random.randint(k4, (B2, T2), 0, V2, dtype=jnp.int32)
    loss2, correct2 = cross_entropy_pallas(logits2, targets2)
    jax.block_until_ready((loss2, correct2))
    ref_loss2, ref_correct2 = _reference(logits2, targets2)
    assert jnp.allclose(loss2, ref_loss2, atol=1e-4, rtol=1e-4), (loss2, ref_loss2)
    assert int(correct2) == int(ref_correct2), (correct2, ref_correct2)

    # Case 3: force the vocab-chunked online-LSE path (3 chunks, ragged last chunk)
    #         and exercise ignore_index=-100 padding targets.
    B3, T3, V3 = 4, 8, 320
    logits3 = jax.random.normal(k5, (B3, T3, V3), dtype=jnp.float32)
    targets3 = jax.random.randint(k6, (B3, T3), 0, V3, dtype=jnp.int32)
    targets3 = targets3.at[0, :3].set(-100)           # padding tokens
    loss3, correct3 = cross_entropy_pallas(logits3, targets3, v_chunk=128)
    jax.block_until_ready((loss3, correct3))
    ref_loss3, ref_correct3 = _reference(logits3, targets3)
    assert jnp.allclose(loss3, ref_loss3, atol=1e-5, rtol=1e-5), (loss3, ref_loss3)
    assert int(correct3) == int(ref_correct3), (correct3, ref_correct3)

    print("KERNEL_OK")
</pallas_src>

<mosaic_0001>
module attributes {stable_mosaic.version = 11 : i64} {
  func.func @_ce_kernel(%arg0: i32, %arg1: i32, %arg2: memref<8x32xf32, #tpu.memory_space<vmem>>, %arg3: memref<8x1xi32, #tpu.memory_space<vmem>>, %arg4: memref<8x1xf32, #tpu.memory_space<vmem>>, %arg5: memref<8x1xi32, #tpu.memory_space<vmem>>, %arg6: memref<8x1xf32, #tpu.memory_space<vmem>>, %arg7: memref<8x1xf32, #tpu.memory_space<vmem>>, %arg8: memref<8x1xf32, #tpu.memory_space<vmem>>, %arg9: memref<8x1xi32, #tpu.memory_space<vmem>>) attributes {dimension_semantics = [#tpu.dimension_semantics<parallel>, #tpu.dimension_semantics<arbitrary>], iteration_bounds = array<i64: 2, 1>, scalar_prefetch = 0 : i64, scratch_operands = 4 : i64, tpu.core_type = #tpu.core_type<tc>, window_params = [{transform_indices = @transform_0, window_bounds = array<i64: 8, 32>}, {transform_indices = @transform_1, window_bounds = array<i64: 8, 1>}, {transform_indices = @transform_2, window_bounds = array<i64: 8, 1>}, {transform_indices = @transform_3, window_bounds = array<i64: 8, 1>}]} {
    %c0_i32 = arith.constant 0 : i32
    %0 = arith.cmpi eq, %arg1, %c0_i32 : i32
    %1 = arith.extui %0 : i1 to i32
    %c0_i32_0 = arith.constant 0 : i32
    %2 = arith.cmpi ne, %1, %c0_i32_0 : i32
    scf.if %2 {
      %cst_27 = arith.constant 0xFF800000 : f32
      %47 = vector.broadcast %cst_27 : f32 to vector<8x1xf32>
      %c0_28 = arith.constant 0 : index
      %c0_29 = arith.constant 0 : index
      %48 = vector.load %arg6[%c0_28, %c0_29] : memref<8x1xf32, #tpu.memory_space<vmem>>, vector<8x1xf32>
      tpu.vector_store %arg6[%c0_28, %c0_29], %47 {strides = array<i32>} : memref<8x1xf32, #tpu.memory_space<vmem>>, vector<8x1xf32>,
      %cst_30 = arith.constant 0.000000e+00 : f32
      %49 = vector.broadcast %cst_30 : f32 to vector<8x1xf32>
      %c0_31 = arith.constant 0 : index
      %c0_32 = arith.constant 0 : index
      %50 = vector.load %arg7[%c0_31, %c0_32] : memref<8x1xf32, #tpu.memory_space<vmem>>, vector<8x1xf32>
      tpu.vector_store %arg7[%c0_31, %c0_32], %49 {strides = array<i32>} : memref<8x1xf32, #tpu.memory_space<vmem>>, vector<8x1xf32>,
      %cst_33 = arith.constant 0xFF800000 : f32
      %51 = vector.broadcast %cst_33 : f32 to vector<8x1xf32>
      %c0_34 = arith.constant 0 : index
      %c0_35 = arith.constant 0 : index
      %52 = vector.load %arg8[%c0_34, %c0_35] : memref<8x1xf32, #tpu.memory_space<vmem>>, vector<8x1xf32>
      tpu.vector_store %arg8[%c0_34, %c0_35], %51 {strides = array<i32>} : memref<8x1xf32, #tpu.memory_space<vmem>>, vector<8x1xf32>,
      %c32_i32_36 = arith.constant 32 : i32
      %53 = vector.broadcast %c32_i32_36 : i32 to vector<8x1xi32>
      %c0_37 = arith.constant 0 : index
      %c0_38 = arith.constant 0 : index
      %54 = vector.load %arg9[%c0_37, %c0_38] : memref<8x1xi32, #tpu.memory_space<vmem>>, vector<8x1xi32>
      tpu.vector_store %arg9[%c0_37, %c0_38], %53 {strides = array<i32>} : memref<8x1xi32, #tpu.memory_space<vmem>>, vector<8x1xi32>,
    } else {
    }
    %c0 = arith.constant 0 : index
    %c0_1 = arith.constant 0 : index
    %3 = vector.load %arg3[%c0, %c0_1] : memref<8x1xi32, #tpu.memory_space<vmem>>, vector<8x1xi32>
    %c0_2 = arith.constant 0 : index
    %c0_3 = arith.constant 0 : index
    %4 = vector.load %arg2[%c0_2, %c0_3] : memref<8x32xf32, #tpu.memory_space<vmem>>, vector<8x32xf32>
    %c32_i32 = arith.constant 32 : i32
    %5 = arith.muli %arg1, %c32_i32 : i32
    %6 = tpu.iota {dimensions = array<i32: 1>} : vector<8x32xi32>
    %7 = vector.broadcast %5 : i32 to vector<8x32xi32>
    %8 = arith.addi %7, %6 : vector<8x32xi32>
    %cst = arith.constant dense<0xFF800000> : vector<8xf32>
    %9 = vector.multi_reduction <maximumf>, %4, %cst [1] : vector<8x32xf32> to vector<8xf32>
    %10 = vector.shape_cast %9 : vector<8xf32> to vector<8x1xf32>
    %c0_4 = arith.constant 0 : index
    %c0_5 = arith.constant 0 : index
    %11 = vector.load %arg6[%c0_4, %c0_5] : memref<8x1xf32, #tpu.memory_space<vmem>>, vector<8x1xf32>
    %12 = arith.maximumf %11, %10 : vector<8x1xf32>
    %13 = vector.broadcast %12 : vector<8x1xf32> to vector<8x32xf32>
    %14 = arith.subf %4, %13 : vector<8x32xf32>
    %15 = math.exp %14 : vector<8x32xf32>
    %c0_6 = arith.constant 0 : index
    %c0_7 = arith.constant 0 : index
    %16 = vector.load %arg7[%c0_6, %c0_7] : memref<8x1xf32, #tpu.memory_space<vmem>>, vector<8x1xf32>
    %17 = arith.subf %11, %12 : vector<8x1xf32>
    %18 = math.exp %17 : vector<8x1xf32>
    %19 = arith.mulf %16, %18 : vector<8x1xf32>
    %cst_8 = arith.constant dense<0.000000e+00> : vector<8xf32>
    %20 = vector.multi_reduction <add>, %15, %cst_8 [1] : vector<8x32xf32> to vector<8xf32>
    %21 = vector.shape_cast %20 : vector<8xf32> to vector<8x1xf32>
    %22 = arith.addf %19, %21 : vector<8x1xf32>
    %c0_9 = arith.constant 0 : index
    %c0_10 = arith.constant 0 : index
    %23 = vector.load %arg7[%c0_9, %c0_10] : memref<8x1xf32, #tpu.memory_space<vmem>>, vector<8x1xf32>
    tpu.vector_store %arg7[%c0_9, %c0_10], %22 {strides = array<i32>} : memref<8x1xf32, #tpu.memory_space<vmem>>, vector<8x1xf32>,
    %c0_11 = arith.constant 0 : index
    %c0_12 = arith.constant 0 : index
    %24 = vector.load %arg6[%c0_11, %c0_12] : memref<8x1xf32, #tpu.memory_space<vmem>>, vector<8x1xf32>
    tpu.vector_store %arg6[%c0_11, %c0_12], %12 {strides = array<i32>} : memref<8x1xf32, #tpu.memory_space<vmem>>, vector<8x1xf32>,
    %25 = vector.broadcast %3 : vector<8x1xi32> to vector<8x32xi32>
    %26 = arith.cmpi eq, %8, %25 : vector<8x32xi32>
    %cst_13 = arith.constant 0xFF800000 : f32
    %27 = vector.broadcast %cst_13 : f32 to vector<8x32xf32>
    %28 = arith.select %26, %4, %27 : vector<8x32xi1>, vector<8x32xf32>
    %cst_14 = arith.constant dense<0xFF800000> : vector<8xf32>
    %29 = vector.multi_reduction <maximumf>, %28, %cst_14 [1] : vector<8x32xf32> to vector<8xf32>
    %30 = vector.shape_cast %29 : vector<8xf32> to vector<8x1xf32>
    %c0_15 = arith.constant 0 : index
    %c0_16 = arith.constant 0 : index
    %31 = vector.load %arg8[%c0_15, %c0_16] : memref<8x1xf32, #tpu.memory_space<vmem>>, vector<8x1xf32>
    %32 = arith.maximumf %31, %30 : vector<8x1xf32>
    %c0_17 = arith.constant 0 : index
    %c0_18 = arith.constant 0 : index
    %33 = vector.load %arg8[%c0_17, %c0_18] : memref<8x1xf32, #tpu.memory_space<vmem>>, vector<8x1xf32>
    tpu.vector_store %arg8[%c0_17, %c0_18], %32 {strides = array<i32>} : memref<8x1xf32, #tpu.memory_space<vmem>>, vector<8x1xf32>,
    %34 = vector.broadcast %10 : vector<8x1xf32> to vector<8x32xf32>
    %35 = arith.cmpf oeq, %4, %34 : vector<8x32xf32>
    %c32_i32_19 = arith.constant 32 : i32
    %36 = vector.broadcast %c32_i32_19 : i32 to vector<8x32xi32>
    %37 = arith.select %35, %8, %36 : vector<8x32xi1>, vector<8x32xi32>
    %cst_20 = arith.constant dense<2147483647> : vector<8xi32>
    %38 = vector.multi_reduction <minsi>, %37, %cst_20 [1] : vector<8x32xi32> to vector<8xi32>
    %39 = vector.shape_cast %38 : vector<8xi32> to vector<8x1xi32>
    %40 = arith.cmpf ogt, %10, %11 : vector<8x1xf32>
    %c0_21 = arith.constant 0 : index
    %c0_22 = arith.constant 0 : index
    %41 = vector.load %arg9[%c0_21, %c0_22] : memref<8x1xi32, #tpu.memory_space<vmem>>, vector<8x1xi32>
    %42 = arith.select %40, %39, %41 : vector<8x1xi1>, vector<8x1xi32>
    %c0_23 = arith.constant 0 : index
    %c0_24 = arith.constant 0 : index
    %43 = vector.load %arg9[%c0_23, %c0_24] : memref<8x1xi32, #tpu.memory_space<vmem>>, vector<8x1xi32>
    tpu.vector_store %arg9[%c0_23, %c0_24], %42 {strides = array<i32>} : memref<8x1xi32, #tpu.memory_space<vmem>>, vector<8x1xi32>,
    %c0_i32_25 = arith.constant 0 : i32
    %44 = arith.cmpi eq, %arg1, %c0_i32_25 : i32
    %45 = arith.extui %44 : i1 to i32
    %c0_i32_26 = arith.constant 0 : i32
    %46 = arith.cmpi ne, %45, %c0_i32_26 : i32
    scf.if %46 {
      %c0_27 = arith.constant 0 : index
      %c0_28 = arith.constant 0 : index
      %47 = vector.load %arg7[%c0_27, %c0_28] : memref<8x1xf32, #tpu.memory_space<vmem>>, vector<8x1xf32>
      %48 = math.log %47 : vector<8x1xf32>
      %c0_29 = arith.constant 0 : index
      %c0_30 = arith.constant 0 : index
      %49 = vector.load %arg6[%c0_29, %c0_30] : memref<8x1xf32, #tpu.memory_space<vmem>>, vector<8x1xf32>
      %50 = arith.addf %48, %49 : vector<8x1xf32>
      %c0_31 = arith.constant 0 : index
      %c0_32 = arith.constant 0 : index
      %51 = vector.load %arg8[%c0_31, %c0_32] : memref<8x1xf32, #tpu.memory_space<vmem>>, vector<8x1xf32>
      %52 = arith.subf %50, %51 : vector<8x1xf32>
      %c-100_i32 = arith.constant -100 : i32
      %53 = vector.broadcast %c-100_i32 : i32 to vector<8x1xi32>
      %54 = arith.cmpi eq, %3, %53 : vector<8x1xi32>
      %cst_33 = arith.constant 0.000000e+00 : f32
      %55 = vector.broadcast %cst_33 : f32 to vector<8x1xf32>
      %56 = arith.select %54, %55, %52 : vector<8x1xi1>, vector<8x1xf32>
      %c0_34 = arith.constant 0 : index
      %c0_35 = arith.constant 0 : index
      %57 = vector.load %arg4[%c0_34, %c0_35] : memref<8x1xf32, #tpu.memory_space<vmem>>, vector<8x1xf32>
      tpu.vector_store %arg4[%c0_34, %c0_35], %56 {strides = array<i32>} : memref<8x1xf32, #tpu.memory_space<vmem>>, vector<8x1xf32>,
      %c0_36 = arith.constant 0 : index
      %c0_37 = arith.constant 0 : index
      %58 = vector.load %arg9[%c0_36, %c0_37] : memref<8x1xi32, #tpu.memory_space<vmem>>, vector<8x1xi32>
      %59 = arith.cmpi eq, %58, %3 : vector<8x1xi32>
      %60 = arith.extui %59 : vector<8x1xi1> to vector<8x1xi32>
      %c0_38 = arith.constant 0 : index
      %c0_39 = arith.constant 0 : index
      %61 = vector.load %arg5[%c0_38, %c0_39] : memref<8x1xi32, #tpu.memory_space<vmem>>, vector<8x1xi32>
      tpu.vector_store %arg5[%c0_38, %c0_39], %60 {strides = array<i32>} : memref<8x1xi32, #tpu.memory_space<vmem>>, vector<8x1xi32>,
    } else {
    }
    return
  }
  func.func @transform_0(%arg0: i32, %arg1: i32) -> (i32, i32) {
    %c0_i32 = arith.constant 0 : i32
    return %arg0, %arg1 : i32, i32
  }
  func.func @transform_1(%arg0: i32, %arg1: i32) -> (i32, i32) {
    %c0_i32 = arith.constant 0 : i32
    %c0_i32_0 = arith.constant 0 : i32
    return %arg0, %c0_i32 : i32, i32
  }
  func.func @transform_2(%arg0: i32, %arg1: i32) -> (i32, i32) {
    %c0_i32 = arith.constant 0 : i32
    %c0_i32_0 = arith.constant 0 : i32
    return %arg0, %c0_i32 : i32, i32
  }
  func.func @transform_3(%arg0: i32, %arg1: i32) -> (i32, i32) {
    %c0_i32 = arith.constant 0 : i32
    %c0_i32_0 = arith.constant 0 : i32
    return %arg0, %c0_i32 : i32, i32
  }
}

</mosaic_0001>

<bundles_post_ra>
// kernel: cross_entropy_pallas.1
= control target key start
LH: loop header
LB: loop body
LE: loop exit
PB: predicated region body
PF: predicated region fallthrough
CT: control target
= control target key end

     0   :  { %s510_s12 = smov 0   ;;  %s512_s13 = smov 0   ;;  %s572_s0 = inlined_call_operand.vmem [shape: f32[16,32], index: 0, kind: input, shape index: {}]   ;;  %s573_s1 = inlined_call_operand.vmem [shape: s32[16,1], index: 1, kind: input, shape index: {}]   ;;  %s574_s2 = inlined_call_operand.vmem [shape: f32[16,1], index: 2, kind: output, shape index: {0}]   ;;  %s575_s3 = inlined_call_operand.vmem [shape: s32[16,1], index: 3, kind: output, shape index: {1}]  }
   0x1   :  { %s514_s14 = smov 0  }
   0x2 LB: > { %s26_s15 = sadd.s32 1, %s480_s13  ;;  %p419_p0 = scmp.ge.s32.totalorder %s484_s14, 1  ;;  %s484_s14 = sphi %s514_s14, %s14_s14   ;;  %s480_s13 = sphi %s512_s13, %s577_s13   ;;  %s476_s12 = sphi %s510_s12, %s576_s12  }
   0x3   : > { %p28_p1 = scmp.ge.s32.totalorder %s26_s15, 2  ;;  %p165_p2 = scmp.lt.s32.totalorder %s484_s14, 3 }
   0x5   : > { %s579_s15 = smov (%p28_p1, %s26_s15), 0  ;;  %p166_p3 = pnand %p419_p0, %p165_p2 }
   0x6   : > { %p198_p4 = scmp.lt.s32.totalorder (!%p166_p3), %s476_s12, 1 }
   0x7   : > { %169 = sbr.rel (%p166_p3) target bundleno = 414 (0x19e), region = 28 }
   0xc   : > { %vm221_vm0 = vcmask 7168   ;;  %v486_v0 = vmov -inf   ;;  %s581_s12 = smov (!%p198_p4, %s476_s12), 1  ;;  %vm233_vm1 = vcmask 261120   ;;  %v487_v3 = vmov 0  }
   0xd   : > { %222 = vst.msk [vmem:[#allocation2] sm:$0xff] %vm221_vm0, %v486_v0  ;;  %s530_s16 = sshll.u32 %s581_s12, 3  ;;  %454 = vset.pattern.permute.xlu0 %v487_v3  ;;  %455 = vset.pattern.permute.xlu1 %v487_v3  ;;  %v488_v4 = vmov 0.0   ;;  %v229_v5 = vlaneseq  ;;  %v489_v28 = vmov 32  }
   0xe   : > { %224 = vst.msk [vmem:[#allocation4] sm:$0xff] %vm221_vm0, %v486_v0  ;;  %s204_s19 = scalar_lea.vmem %s572_s0, %s530_s16  ;;  %s208_s22 = scalar_lea.vmem %s573_s1, %s530_s16 }
   0xf   : > { %v227_v1 = vld [vmem:[%s204_s19] sm:$0xff]  ;;  %223 = vst.msk [vmem:[#allocation3] sm:$0xff] %vm221_vm0, %v488_v4  ;;  %v230_v7 = vand.u32 127, %v229_v5  ;;  %s216_s25 = scalar_lea.vmem %s575_s3, %s530_s16  ;;  %s212_s28 = scalar_lea.vmem %s574_s2, %s530_s16 }
  0x10   : > { %v234_v2 = vsel %vm233_vm1, %v227_v1, -inf  ;;  %v226_v15 = vld [vmem:[%s208_s22] sm:$0xff]  ;;  %225 = vst.msk [vmem:[#allocation5] sm:$0xff] %vm221_vm0, %v489_v28 }
  0x11   : > { %235 = vmax.xlane.f32.xlu0 %v234_v2  ;;  %vm301_vm7 = vcmp.eq.s32.totalorder %v226_v15, 4294967196 }
  0x14   : > { %v237_v6 = vld [vmem:[#allocation2] sm:$0xff] }
  0x15   : > { %v267_v43 = vld [vmem:[#allocation4] sm:$0xff] }
  0x16   : > { %v247_v31 = vld [vmem:[#allocation3] sm:$0xff] }
  0x17   : > { %v288_v39 = vld [vmem:[#allocation5] sm:$0xff] }
  0x84   : > { %v236_v8 = vpop.xlane.xlu0 %235 }
  0x85   : > { %v238_v9 = vmax.f32 %v237_v6, %v236_v8  ;;  %vm270_vm2 = vcmp.eq.f32.partialorder %v227_v1, %v236_v8  ;;  %vm287_vm5 = vcmp.gt.f32.partialorder %v236_v8, %v237_v6 }
  0x86   : > { %v271_v10 = vsel %vm270_vm2, %v230_v7, 32 }
  0x87   : > { %v248_v11 = vsub.f32 %v237_v6, %v238_v9  ;;  %258 = vst.msk [vmem:[#allocation2] sm:$0xff] %vm221_vm0, %v238_v9  ;;  %241 = vperm.xlu0 %454, %v238_v9   ;;  %v272_v12 = vsel %vm233_vm1, %v271_v10, 2147483647 }
  0x88   : > { %v274_v13 = vshra.s32 %v272_v12, 16  ;;  %v273_v22 = vand.u32 65535, %v272_v12 }
  0x89   : > { %v249_v29 = vmul.f32 1.442695, %v248_v11 }
  0x8a   : > { %v276_v14 = vcvt.s32.f32 %v274_v13  ;;  %v275_v23 = vcvt.s32.f32 %v273_v22 }
  0x8c   : > { %277 = vmin.xlane.f32.xlu1 %v276_v14 }
  0x8e   : > { %v297_v50 = vld [vmem:[#allocation2] sm:$0xff] }
  0xa5   : > { %260 = vperm.xlu1 %455, %v226_v15  }
  0xf9   : > { %v242_v16 = vpop.permute.xlu0 %241 }
  0xfa   : > { %v244_v17 = vsub.f32 %v227_v1, %v242_v16 }
  0xfc   : > { %v245_v18 = vmul.f32 1.442695, %v244_v17 }
  0xfe   : > { %456 = vpow2.f32 %v245_v18 }
  0xff   : > { %v278_v21 = vpop.xlane.xlu1 %277  ;;  %458 = vpow2.f32 %v249_v29 }
 0x100   : > { %vm279_vm3 = vcmp.eq.f32.partialorder %v276_v14, %v278_v21  ;;  %v284_v35 = vcvt.f32.s32 %v278_v21 }
 0x101   : > { %v280_v24 = vsel %vm279_vm3, %v275_v23, inf }
 0x102   : > { %v285_v37 = vshll.u32 %v284_v35, 16 }
 0x104   : > { %v457_v19 = vpop.eup %456 }
 0x105   : > { %v252_v20 = vsel %vm233_vm1, %v457_v19, 0.0  ;;  %v459_v30 = vpop.eup %458 }
 0x106   : > { %253 = vadd.xlane.f32.xlu2 %v252_v20  ;;  %v251_v32 = vmul.f32 %v459_v30, %v247_v31 }
 0x10e   : > { %281 = vmin.xlane.f32.xlu2 %v280_v24 }
 0x117   : > { %v261_v25 = vpop.permute.xlu1 %260 }
 0x118   : > { %vm262_vm4 = vcmp.eq.s32.totalorder %v230_v7, %v261_v25 }
 0x119   : > { %v263_v26 = vsel %vm262_vm4, %v227_v1, -inf }
 0x11a   : > { %v264_v27 = vsel %vm233_vm1, %v263_v26, -inf }
 0x11b   : > { %265 = vmax.xlane.f32.xlu2 %v264_v27 }
 0x179   : > { %v254_v33 = vpop.xlane.xlu2 %253 }
 0x17a   : > { %v255_v34 = vadd.f32 %v254_v33, %v251_v32 }
 0x17c   : > { %257 = vst.msk [vmem:[#allocation3] sm:$0xff] %vm221_vm0, %v255_v34 }
 0x181   : > { %v282_v36 = vpop.xlane.xlu2 %281 }
 0x182   : > { %v283_v38 = vcvt.f32.s32 %v282_v36 }
 0x183   : > { %v294_v42 = vld [vmem:[#allocation3] sm:$0xff] }
 0x184   : > { %v286_v40 = vadd.s32 %v285_v37, %v283_v38  ;;  %460 = vlog2.f32 %v294_v42 }
 0x186   : > { %v289_v41 = vsel %vm287_vm5, %v286_v40, %v288_v39 }
 0x187   : > { %290 = vst.msk [vmem:[#allocation5] sm:$0xff] %vm221_vm0, %v289_v41 }
 0x18a   : > { %v461_v48 = vpop.eup %460 }
 0x18b   : > { %v296_v49 = vmul.f32 0.6931472, %v461_v48 }
 0x18d   : > { %v298_v51 = vadd.f32 %v297_v50, %v296_v49 }
 0x18e   : > { %v304_v44 = vld [vmem:[#allocation5] sm:$0xff]  ;;  %v266_v45 = vpop.xlane.xlu2 %265 }
 0x18f   : > { %vm305_vm6 = vcmp.eq.s32.totalorder %v304_v44, %v226_v15  ;;  %v268_v46 = vmax.f32 %v267_v43, %v266_v45 }
 0x190   : > { %v306_v47 = vsel %vm305_vm6, 1, %v487_v3 }
 0x191   : > { %307 = vst.msk [vmem:[%s216_s25] sm:$0xff] %vm221_vm0, %v306_v47 }
 0x192   : > { %269 = vst.msk [vmem:[#allocation4] sm:$0xff] %vm221_vm0, %v268_v46 }
 0x199   : > { %v299_v52 = vld [vmem:[#allocation4] sm:$0xff] }
 0x19a   : > { %v300_v53 = vsub.f32 %v298_v51, %v299_v52 }
 0x19c   : > { %v302_v54 = vsel %vm301_vm7, 0.0, %v300_v53 }
 0x19d   : > { %303 = vst.msk [vmem:[%s212_s28] sm:$0xff] %vm221_vm0, %v302_v54 }
 0x19e PF: > { %s14_s14 = sadd.s32 1, %s484_s14   ;;  %s576_s12 = smov %s480_s13 }
 0x19f   : > { %p11_p5 = scmp.ge.s32.totalorder %s14_s14, 4   ;;  %s577_s13 = smov %s579_s15 }
 0x1a1   :  { %13 = sbr.rel (!%p11_p5) target bundleno = 2 (0x2), region = 81 }

</bundles_post_ra>
